<compile_context>
chip_gen: v6e
topology: v6e:2x2x1
jax: 0.10.0
libtpu: 0.0.40
codegen_flags: <defaults>
</compile_context>

<pallas_src>
import math

import jax
import jax.numpy as jnp
from jax import lax
from jax.experimental import pallas as pl
from jax.experimental.pallas import tpu as pltpu


def temporal_decay_kernel(d_ref, w_ref, b_ref, o_ref):
    # d_ref: (tb, P*In)  w_ref: (P*Out, P*In)  b_ref: (1, P*Out)  o_ref: (tb, P*Out)
    z = lax.dot_general(
        d_ref[...], w_ref[...],
        dimension_numbers=(((1,), (1,)), ((), ())),   # contract In dims; no W transpose
        preferred_element_type=jnp.float32,           # MXU, f32 accumulation
    )
    z = jnp.maximum(z + b_ref[...], 0.0)              # bias + ReLU   (VPU)
    o_ref[...] = jnp.exp(-z).astype(o_ref.dtype)      # exp           (EUP)


def _device_kind() -> str:
    try:
        return jax.devices()[0].device_kind.lower()
    except Exception:
        return ""


def _target_lanes(kind: str) -> int:
    # 128-wide packing matches v5e's 4x128^2 MXU; 256 fills v6e/v7x's 2x256^2 MXU.
    return 128 if any(t in kind for t in ("v2", "v3", "v4", "v5")) else 256


def _two_tensorcores(kind: str) -> bool:
    return "v7" in kind            # v7x: 2 TensorCores shard the 'parallel' grid axis


def _sublane(dtype) -> int:
    return {4: 8, 2: 16, 1: 32}.get(jnp.dtype(dtype).itemsize, 8)


def _lane_padded_bytes(cols: int, itemsize: int) -> int:
    return pl.cdiv(cols, 128) * 128 * itemsize        # VMEM pads the lane dim to 128


def _pick_pack(batch: int, in_size: int, out_size: int, lane_target: int) -> int:
    """Largest P that divides the batch with P*max(In,Out) <= lane_target."""
    max_p = max(1, lane_target // max(in_size, out_size, 1))
    for p in range(max_p, 0, -1):
        if batch % p == 0:
            return p
    return 1


def _pick_tb(rows, in_cols, out_cols, in_itemsize, out_itemsize, sublane,
             two_cores, budget_bytes=12 << 20):
    """Row-tile size: as large as the lane-padding-aware, double-buffered VMEM
    budget allows.  Single-TC chips get one big tile; v7x targets ~8 shards only
    when each shard still has >= 1024 rows."""
    per_row = 2 * (_lane_padded_bytes(in_cols, in_itemsize) +
                   _lane_padded_bytes(out_cols, out_itemsize))
    tb = min(4096, budget_bytes // max(per_row, 1))
    if two_cores:
        shard = pl.cdiv(rows, 8)
        if shard >= 1024:
            tb = min(tb, shard)
    if tb >= rows:
        return rows                                   # full-extent block: always legal
    return max(sublane, (tb // sublane) * sublane)


def temporal_decay(d, W, b, *, tb=None, compute_dtype=None, out_dtype=jnp.float32,
                   xla_rows_threshold=1024):
    """gamma = exp(-relu(d @ W.T + b)) via a lane-dense Pallas TPU kernel.

    compute_dtype: optionally stream d / W as bf16 (f32 accumulation) to roughly
      halve HBM read traffic on this bandwidth-bound op; default f32 matches the
      PyTorch reference numerics.
    out_dtype: output dtype (bf16 halves write traffic when downstream tolerates it).
    xla_rows_threshold: below this many rows the pallas_call fixed cost dominates,
      so fall back to plain XLA (set 0 to force the kernel).
    """
    B, In = d.shape
    Out, In_w = W.shape
    assert In == In_w, "W must be (output_size, input_size)"

    if compute_dtype is not None:
        d = d.astype(compute_dtype)
        W = W.astype(compute_dtype)
    b_f32 = b.astype(jnp.float32)

    if B < xla_rows_threshold:
        # Small-batch fast path: a standalone kernel cannot beat fused XLA here.
        z = jnp.dot(d, W.T, preferred_element_type=jnp.float32) + b_f32[None, :]
        return jnp.exp(-jnp.maximum(z, 0.0)).astype(out_dtype)

    kind = _device_kind()
    P = _pick_pack(B, In, Out, _target_lanes(kind))

    # Lane-dense packing: d viewed as (B/P, P*In) (free row-major reshape), W
    # replicated block-diagonally so the packed output is bit-identical to (B, Out).
    Wblk = jnp.kron(jnp.eye(P, dtype=W.dtype), W)         # (P*Out, P*In), built once
    b_blk = jnp.tile(b_f32, P).reshape(1, P * Out)        # (1, P*Out)
    rows = B // P
    cols_in, cols_out = P * In, P * Out
    d_p = d.reshape(rows, cols_in)

    sublane = _sublane(d.dtype)
    in_bytes = jnp.dtype(d.dtype).itemsize
    out_bytes = jnp.dtype(out_dtype).itemsize
    if tb is None:
        tb = _pick_tb(rows, cols_in, cols_out, in_bytes, out_bytes, sublane,
                      _two_tensorcores(kind))
    else:
        tb = int(tb)
        tb = rows if tb >= rows else max(sublane, (tb // sublane) * sublane)

    grid = (pl.cdiv(rows, tb),)   # ragged last tile handled by Pallas boundary masking

    out = pl.pallas_call(
        temporal_decay_kernel,
        out_shape=jax.ShapeDtypeStruct((rows, cols_out), out_dtype),
        grid_spec=pltpu.PrefetchScalarGridSpec(
            num_scalar_prefetch=0,
            grid=grid,
            in_specs=[
                # Streamed d tile.  TODO(synk): if DMA is still exposed after the
                # lane-dense packing, try pipeline_mode=pl.Buffered(3) here.
                pl.BlockSpec((tb, cols_in), lambda i: (i, 0)),
                pl.BlockSpec((cols_out, cols_in), lambda i: (0, 0)),  # Wblk: constant
                pl.BlockSpec((1, cols_out), lambda i: (0, 0)),        # bias: constant
            ],
            out_specs=pl.BlockSpec((tb, cols_out), lambda i: (i, 0)),
        ),
        compiler_params=pltpu.CompilerParams(
            dimension_semantics=("parallel",),    # independent batch tiles
            vmem_limit_bytes=32 << 20,            # headroom over the ~12 MiB tile budget
        ),
    )(d_p, Wblk, b_blk)

    return out.reshape(B, Out)


def temporal_decay_ref(d, W, b):
    return jnp.exp(-jnp.maximum(d @ W.T + b[None, :], 0.0))


if __name__ == "__main__":
    input_size, output_size = 32, 32

    key = jax.random.PRNGKey(0)
    k_d, k_w, k_b = jax.random.split(key, 3)

    # Deterministic init mirroring reset_parameters(): U(-stdv, stdv), stdv=1/sqrt(Out).
    stdv = 1.0 / math.sqrt(output_size)
    W = jax.random.uniform(k_w, (output_size, input_size),
                           minval=-stdv, maxval=stdv, dtype=jnp.float32)
    b = jax.random.uniform(k_b, (output_size,),
                           minval=-stdv, maxval=stdv, dtype=jnp.float32)

    # 1) f32 kernel path: batch divisible by the pack factor, single lane-dense block.
    batch = 64
    d = jax.random.uniform(k_d, (batch, input_size),
                           minval=0.0, maxval=5.0, dtype=jnp.float32)
    gamma = jax.block_until_ready(temporal_decay(d, W, b, xla_rows_threshold=0))
    assert gamma.shape == (batch, output_size)
    assert jnp.allclose(gamma, temporal_decay_ref(d, W, b), atol=1e-5, rtol=1e-5), \
        "mismatch vs reference (f32)"

    # 2) Batch not divisible by 8: pack factor falls back to a smaller divisor; no
    #    wrapper pad / slice round trip is used anywhere.
    d2 = jax.random.uniform(jax.random.PRNGKey(1), (50, input_size),
                            minval=0.0, maxval=5.0, dtype=jnp.float32)
    gamma2 = jax.block_until_ready(temporal_decay(d2, W, b, xla_rows_threshold=0))
    assert gamma2.shape == (50, output_size)
    assert jnp.allclose(gamma2, temporal_decay_ref(d2, W, b), atol=1e-5, rtol=1e-5), \
        "mismatch vs reference (odd batch)"

    # 3) Multi-step grid with a ragged last tile (forced small tb), then the bf16
    #    streaming path (looser tolerance: bf16-rounded logits inside exp(-relu(.))).
    d3 = jax.random.uniform(jax.random.PRNGKey(2), (200, input_size),
                            minval=0.0, maxval=5.0, dtype=jnp.float32)
    gamma3 = jax.block_until_ready(temporal_decay(d3, W, b, tb=8, xla_rows_threshold=0))
    assert jnp.allclose(gamma3, temporal_decay_ref(d3, W, b), atol=1e-5, rtol=1e-5), \
        "mismatch vs reference (ragged grid)"

    gamma3_bf16 = jax.block_until_ready(
        temporal_decay(d3, W, b, compute_dtype=jnp.bfloat16, xla_rows_threshold=0))
    assert jnp.allclose(gamma3_bf16, temporal_decay_ref(d3, W, b),
                        atol=5e-2, rtol=5e-2), "mismatch vs reference (bf16)"

    # 4) Default small-batch fast path (plain XLA below the threshold).
    d4 = jax.random.uniform(jax.random.PRNGKey(3), (8, input_size),
                            minval=0.0, maxval=5.0, dtype=jnp.float32)
    gamma4 = jax.block_until_ready(temporal_decay(d4, W, b))
    assert jnp.allclose(gamma4, temporal_decay_ref(d4, W, b), atol=1e-5, rtol=1e-5), \
        "mismatch vs reference (XLA fallback)"

    print("KERNEL_OK")
</pallas_src>

<mosaic_0001>
module attributes {stable_mosaic.version = 11 : i64} {
  func.func @temporal_decay_kernel(%arg0: i32, %arg1: memref<8x256xf32, #tpu.memory_space<vmem>>, %arg2: memref<256x256xf32, #tpu.memory_space<vmem>>, %arg3: memref<1x256xf32, #tpu.memory_space<vmem>>, %arg4: memref<8x256xf32, #tpu.memory_space<vmem>>) attributes {dimension_semantics = [#tpu.dimension_semantics<parallel>], iteration_bounds = array<i64: 1>, scalar_prefetch = 0 : i64, scratch_operands = 0 : i64, tpu.core_type = #tpu.core_type<tc>, window_params = [{transform_indices = @transform_0, window_bounds = array<i64: 8, 256>}, {pipeline_mode = #tpu.pipeline_mode<synchronous>, transform_indices = @transform_1, window_bounds = array<i64: 256, 256>}, {pipeline_mode = #tpu.pipeline_mode<synchronous>, transform_indices = @transform_2, window_bounds = array<i64: 1, 256>}, {transform_indices = @transform_3, window_bounds = array<i64: 8, 256>}]} {
    %c0 = arith.constant 0 : index
    %c0_0 = arith.constant 0 : index
    %0 = vector.load %arg1[%c0, %c0_0] : memref<8x256xf32, #tpu.memory_space<vmem>>, vector<8x256xf32>
    %c0_1 = arith.constant 0 : index
    %c0_2 = arith.constant 0 : index
    %1 = vector.load %arg2[%c0_1, %c0_2] : memref<256x256xf32, #tpu.memory_space<vmem>>, vector<256x256xf32>
    %cst = arith.constant dense<0.000000e+00> : vector<8x256xf32>
    %2 = tpu.matmul %0, %1, %cst {dimension_numbers = #tpu.dot_dimension_numbers<[1], [1], [0], [0], [0, 0, 1, 0], [], []>} : vector<8x256xf32>, vector<256x256xf32>, vector<8x256xf32> -> vector<8x256xf32>
    %c0_3 = arith.constant 0 : index
    %c0_4 = arith.constant 0 : index
    %3 = vector.load %arg3[%c0_3, %c0_4] : memref<1x256xf32, #tpu.memory_space<vmem>>, vector<1x256xf32>
    %4 = vector.broadcast %3 : vector<1x256xf32> to vector<8x256xf32>
    %5 = arith.addf %2, %4 : vector<8x256xf32>
    %cst_5 = arith.constant 0.000000e+00 : f32
    %6 = vector.broadcast %cst_5 : f32 to vector<8x256xf32>
    %7 = arith.maximumf %5, %6 : vector<8x256xf32>
    %cst_6 = arith.constant 0.000000e+00 : f32
    %8 = vector.broadcast %cst_6 : f32 to vector<8x256xf32>
    %9 = arith.subf %8, %7 : vector<8x256xf32>
    %10 = math.exp %9 : vector<8x256xf32>
    %c0_7 = arith.constant 0 : index
    %c0_8 = arith.constant 0 : index
    %11 = vector.load %arg4[%c0_7, %c0_8] : memref<8x256xf32, #tpu.memory_space<vmem>>, vector<8x256xf32>
    tpu.vector_store %arg4[%c0_7, %c0_8], %10 {strides = array<i32>} : memref<8x256xf32, #tpu.memory_space<vmem>>, vector<8x256xf32>,
    return
  }
  func.func @transform_0(%arg0: i32) -> (i32, i32) {
    %c0_i32 = arith.constant 0 : i32
    %c0_i32_0 = arith.constant 0 : i32
    return %arg0, %c0_i32 : i32, i32
  }
  func.func @transform_1(%arg0: i32) -> (i32, i32) {
    %c0_i32 = arith.constant 0 : i32
    %c0_i32_0 = arith.constant 0 : i32
    %c0_i32_1 = arith.constant 0 : i32
    return %c0_i32, %c0_i32_0 : i32, i32
  }
  func.func @transform_2(%arg0: i32) -> (i32, i32) {
    %c0_i32 = arith.constant 0 : i32
    %c0_i32_0 = arith.constant 0 : i32
    %c0_i32_1 = arith.constant 0 : i32
    return %c0_i32, %c0_i32_0 : i32, i32
  }
  func.func @transform_3(%arg0: i32) -> (i32, i32) {
    %c0_i32 = arith.constant 0 : i32
    %c0_i32_0 = arith.constant 0 : i32
    return %arg0, %c0_i32 : i32, i32
  }
}

</mosaic_0001>

<bundles_post_ra>
// kernel: tpu_custom_call.1
= control target key start
LH: loop header
LB: loop body
LE: loop exit
PB: predicated region body
PF: predicated region fallthrough
CT: control target
= control target key end

     0   :  { %8 = vsyncpa [#allocation3], 0  ;;  %s328_s0 = inlined_call_operand.hbm [shape: f32[8,256], index: 0, kind: input, shape index: {}]   ;;  %s329_s1 = inlined_call_operand.hbm [shape: f32[256,256], index: 1, kind: input, shape index: {}]   ;;  %s330_s2 = inlined_call_operand.vmem [shape: f32[1,256], index: 2, kind: input, shape index: {}]   ;;  %s331_s3 = inlined_call_operand.hbm [shape: f32[8,256], index: 3, kind: output, shape index: {}]  }
   0x1   :  { %9 = vsyncpa [#allocation6], 0 }
   0x2   :  { %10 = vsyncpa [#allocation4], 0  ;;  %s291_s12 = smov [#allocation2]   ;;  %s292_s14 = smov [#allocation5]  }
   0x3   :  { %s17_s13 = sshll.u32 %s291_s12, 4  ;;  %s26_s15 = sshll.u32 %s292_s14, 4  ;;  %s18_s13 = int_to_ptr.vmem [resolvable:$true] %s17_s13  ;;  %s27_s15 = int_to_ptr.vmem [resolvable:$true] %s26_s15 }
   0x4   :  { %s233_s16 = scalar_lea.vmem %s18_s13, 256  ;;  %p238_p1 = scmp.lt.s32.totalorder %s18_s13, %s18_s13 }
   0x5   :  { %p234_p0 = scmp.ne.s32.totalorder %s18_s13, %s233_s16  ;;  %p239_p2 = scmp.lt.s32.totalorder %s233_s16, %s233_s16 }
   0x7   :  { %p240_p3 = por %p239_p2, %p238_p1 }
   0x9   :  { %p241_p4 = pnand %p240_p3, %p234_p0 }
   0xb   :  { %244 = shalt.err (!%p241_p4)
}
   0xc   :  { %20 = dma.hbm_to_vmem [thread:$0]  %s328_s0, 256, %s18_s13, [#allocation3]  }
   0xd   :  { %s253_s19 = scalar_lea.vmem %s27_s15, 8192  ;;  %p258_p6 = scmp.lt.s32.totalorder %s27_s15, %s27_s15 }
   0xe   :  { %p254_p5 = scmp.ne.s32.totalorder %s27_s15, %s253_s19  ;;  %p259_p7 = scmp.lt.s32.totalorder %s253_s19, %s253_s19 }
  0x10   :  { %p260_p8 = por %p259_p7, %p258_p6 }
  0x12   :  { %p261_p9 = pnand %p260_p8, %p254_p5 }
  0x14   :  { %264 = shalt.err (!%p261_p9)
}
  0x15   :  { %s293_s20 = smov 256   ;;  %s294_s21 = smov 16  }
  0x16   :  { %32 = dma.hbm_to_vmem [thread:$0]  %s329_s1, 8192, %s27_s15, [#allocation6], %s293_s20, %s293_s20, %s294_s21  }
  0x17   :  { %285 = dma.done.wait [#allocation3], 256  }
  0x18   :  { %286 = vsyncadd [#allocation3], 4294967040 }
  0x19   :  { %287 = dma.done.wait [#allocation6], 8192  }
  0x1a   :  { %288 = vsyncadd [#allocation6], 4294959104  ;;  %v74_v0 = vld [vmem:[#allocation5 + $0xf8] sm:$0xff]  ;;  %v73_v1 = vld [vmem:[#allocation5 + $0xf0] sm:$0xff]  ;;  %s295_s24 = smov [#allocation7]  }
  0x1b   :  { %v72_v2 = vld [vmem:[#allocation5 + $0xe8] sm:$0xff]  ;;  %119 = vmatprep.subr.mxu0 %v74_v0  ;;  %v71_v3 = vld [vmem:[#allocation5 + $0xe0] sm:$0xff]  ;;  %v70_v4 = vld [vmem:[#allocation5 + $0xd8] sm:$0xff]  ;;  %s206_s25 = sshll.u32 %s295_s24, 4  ;;  %s207_s25 = int_to_ptr.vmem [resolvable:$true] %s206_s25 }
  0x1c   :  { %120 = vmatpush1.xpose.msra.mxu0 %v73_v1  ;;  %v69_v5 = vld [vmem:[#allocation5 + $0xd0] sm:$0xff]  ;;  %v68_v6 = vld [vmem:[#allocation5 + $0xc8] sm:$0xff]  ;;  %v67_v7 = vld [vmem:[#allocation5 + $0xc0] sm:$0xff]  ;;  %p270_p11 = scmp.lt.s32.totalorder %s207_s25, %s207_s25 }
  0x1d   :  { %121 = vmatprep.subr.mxu0 %v72_v2  ;;  %v66_v8 = vld [vmem:[#allocation5 + $0xb8] sm:$0xff]  ;;  %v65_v9 = vld [vmem:[#allocation5 + $0xb0] sm:$0xff]  ;;  %v64_v10 = vld [vmem:[#allocation5 + $0xa8] sm:$0xff]  ;;  %v109_v2 = vlaneseq }
  0x1e   :  { %v63_v11 = vld [vmem:[#allocation5 + $0xa0] sm:$0xff]  ;;  %v62_v12 = vld [vmem:[#allocation5 + $0x98] sm:$0xff]  ;;  %v61_v14 = vld [vmem:[#allocation5 + $0x90] sm:$0xff] }
  0x1f   :  { %v42_v13 = vld [vmem:[#allocation2 + $0x8] sm:$0xff]  ;;  %v60_v15 = vld [vmem:[#allocation5 + $0x88] sm:$0xff]  ;;  %v59_v16 = vld [vmem:[#allocation5 + $0x80] sm:$0xff] }
  0x20   :  { %122 = vmatpush1.xpose.msra.mxu0 %v71_v3  ;;  %183 = vmatprep.mubr.f32.mxu0 %v42_v13  ;;  %v58_v17 = vld [vmem:[#allocation5 + $0x78] sm:$0xff]  ;;  %v57_v18 = vld [vmem:[#allocation5 + $0x70] sm:$0xff]  ;;  %v56_v19 = vld [vmem:[#allocation5 + $0x68] sm:$0xff]  ;;  %v110_v3 = vshrl.u32 %v109_v2, 7 }
  0x21   :  { %123 = vmatprep.subr.mxu0 %v70_v4  ;;  %v55_v20 = vld [vmem:[#allocation5 + $0x60] sm:$0xff]  ;;  %v54_v21 = vld [vmem:[#allocation5 + $0x58] sm:$0xff]  ;;  %v53_v22 = vld [vmem:[#allocation5 + $0x50] sm:$0xff] }
  0x22   :  { %v52_v23 = vld [vmem:[#allocation5 + $0x48] sm:$0xff]  ;;  %v51_v24 = vld [vmem:[#allocation5 + $0x40] sm:$0xff]  ;;  %v50_v25 = vld [vmem:[#allocation5 + $0x38] sm:$0xff]  ;;  %v111_v4 = vsub.s32 0, %v110_v3 }
  0x23   :  { %v49_v26 = vld [vmem:[#allocation5 + $0x30] sm:$0xff]  ;;  %v48_v27 = vld [vmem:[#allocation5 + $0x28] sm:$0xff]  ;;  %v47_v28 = vld [vmem:[#allocation5 + $0x20] sm:$0xff] }
  0x24   :  { %124 = vmatpush1.xpose.msra.mxu0 %v69_v5  ;;  %v46_v29 = vld [vmem:[#allocation5 + $0x18] sm:$0xff]  ;;  %v45_v30 = vld [vmem:[#allocation5 + $0x10] sm:$0xff]  ;;  %v44_v31 = vld [vmem:[#allocation5 + $0x8] sm:$0xff] }
  0x25   :  { %125 = vmatprep.subr.mxu0 %v68_v6  ;;  %v43_v32 = vld [vmem:[#allocation5] sm:$0xff]  ;;  %v106_v33 = vld [vmem:[#allocation5 + $0x1f8] sm:$0xff]  ;;  %v105_v34 = vld [vmem:[#allocation5 + $0x1f0] sm:$0xff]  ;;  %v115_v6 = vsub.s32 1, %v110_v3 }
  0x26   :  { %v104_v35 = vld [vmem:[#allocation5 + $0x1e8] sm:$0xff]  ;;  %v103_v36 = vld [vmem:[#allocation5 + $0x1e0] sm:$0xff]  ;;  %v102_v37 = vld [vmem:[#allocation5 + $0x1d8] sm:$0xff] }
  0x27   :  { %v101_v38 = vld [vmem:[#allocation5 + $0x1d0] sm:$0xff]  ;;  %v100_v39 = vld [vmem:[#allocation5 + $0x1c8] sm:$0xff]  ;;  %v99_v40 = vld [vmem:[#allocation5 + $0x1c0] sm:$0xff] }
  0x28   :  { %126 = vmatpush1.xpose.msra.mxu0 %v67_v7  ;;  %v98_v41 = vld [vmem:[#allocation5 + $0x1b8] sm:$0xff]  ;;  %v97_v42 = vld [vmem:[#allocation5 + $0x1b0] sm:$0xff]  ;;  %v96_v43 = vld [vmem:[#allocation5 + $0x1a8] sm:$0xff] }
  0x29   :  { %127 = vmatprep.subr.mxu0 %v66_v8  ;;  %v95_v44 = vld [vmem:[#allocation5 + $0x1a0] sm:$0xff]  ;;  %v94_v45 = vld [vmem:[#allocation5 + $0x198] sm:$0xff]  ;;  %v93_v46 = vld [vmem:[#allocation5 + $0x190] sm:$0xff] }
  0x2a   :  { %v92_v47 = vld [vmem:[#allocation5 + $0x188] sm:$0xff]  ;;  %v91_v48 = vld [vmem:[#allocation5 + $0x180] sm:$0xff]  ;;  %v90_v49 = vld [vmem:[#allocation5 + $0x178] sm:$0xff] }
  0x2b   :  { %v89_v50 = vld [vmem:[#allocation5 + $0x170] sm:$0xff]  ;;  %v88_v51 = vld [vmem:[#allocation5 + $0x168] sm:$0xff]  ;;  %v87_v52 = vld [vmem:[#allocation5 + $0x160] sm:$0xff] }
  0x2c   :  { %128 = vmatpush1.xpose.msra.mxu0 %v65_v9  ;;  %v86_v53 = vld [vmem:[#allocation5 + $0x158] sm:$0xff]  ;;  %v85_v54 = vld [vmem:[#allocation5 + $0x150] sm:$0xff]  ;;  %v84_v55 = vld [vmem:[#allocation5 + $0x148] sm:$0xff] }
  0x2d   :  { %129 = vmatprep.subr.mxu0 %v64_v10  ;;  %v83_v56 = vld [vmem:[#allocation5 + $0x140] sm:$0xff]  ;;  %v82_v57 = vld [vmem:[#allocation5 + $0x138] sm:$0xff]  ;;  %v81_v58 = vld [vmem:[#allocation5 + $0x130] sm:$0xff] }
  0x2e   :  { %v80_v59 = vld [vmem:[#allocation5 + $0x128] sm:$0xff]  ;;  %v79_v60 = vld [vmem:[#allocation5 + $0x120] sm:$0xff]  ;;  %v78_v61 = vld [vmem:[#allocation5 + $0x118] sm:$0xff] }
  0x2f   :  { %v77_v62 = vld [vmem:[#allocation5 + $0x110] sm:$0xff]  ;;  %v76_v63 = vld [vmem:[#allocation5 + $0x108] sm:$0xff]  ;;  %v75_v0 = vld [vmem:[#allocation5 + $0x100] sm:$0xff] }
  0x30   :  { %130 = vmatpush1.xpose.msra.mxu0 %v63_v11  ;;  %v41_v1 = vld [vmem:[#allocation2] sm:$0xff] }
  0x31   :  { %131 = vmatprep.subr.mxu0 %v62_v12  ;;  %v107_v5 = vld [vmem:[%s330_s2] sm:$0x3]  ;;  %s265_s2 = scalar_lea.vmem %s207_s25, 256 }
  0x32   :  { %v112_v7 = vrot.slane %v107_v5, %v111_v4  ;;  %v116_v8 = vrot.slane %v107_v5, %v115_v6  ;;  %p266_p10 = scmp.ne.s32.totalorder %s207_s25, %s265_s2  ;;  %p271_p12 = scmp.lt.s32.totalorder %s265_s2, %s265_s2 }
  0x34   :  { %132 = vmatpush1.xpose.msra.mxu0 %v61_v14  ;;  %p272_p13 = por %p271_p12, %p270_p11 }
  0x35   :  { %133 = vmatprep.subr.mxu0 %v60_v15 }
  0x36   :  { %p273_p0 = pnand %p272_p13, %p266_p10 }
  0x38   :  { %134 = vmatpush1.xpose.msra.mxu0 %v59_v16 }
  0x39   :  { %135 = vmatprep.subr.mxu0 %v58_v17 }
  0x3c   :  { %136 = vmatpush1.xpose.msra.mxu0 %v57_v18 }
  0x3d   :  { %137 = vmatprep.subr.mxu0 %v56_v19 }
  0x40   :  { %138 = vmatpush1.xpose.msra.mxu0 %v55_v20 }
  0x41   :  { %139 = vmatprep.subr.mxu0 %v54_v21 }
  0x44   :  { %140 = vmatpush1.xpose.msra.mxu0 %v53_v22 }
  0x45   :  { %141 = vmatprep.subr.mxu0 %v52_v23 }
  0x48   :  { %142 = vmatpush1.xpose.msra.mxu0 %v51_v24 }
  0x49   :  { %143 = vmatprep.subr.mxu0 %v50_v25 }
  0x4c   :  { %144 = vmatpush1.xpose.msra.mxu0 %v49_v26 }
  0x4d   :  { %145 = vmatprep.subr.mxu0 %v48_v27 }
  0x50   :  { %146 = vmatpush1.xpose.msra.mxu0 %v47_v28 }
  0x51   :  { %147 = vmatprep.subr.mxu0 %v46_v29 }
  0x54   :  { %148 = vmatpush1.xpose.msra.mxu0 %v45_v30 }
  0x55   :  { %149 = vmatprep.subr.mxu0 %v44_v31 }
  0x58   :  { %150 = vmatpush1.xpose.msra.mxu0 %v43_v32 }
  0x59   :  { %151 = vmatprep.subr.mxu0 %v106_v33 }
  0x5c   :  { %152 = vmatpush2.xpose.msra.mxu0 %v105_v34 }
  0x5d   :  { %153 = vmatprep.subr.mxu0 %v104_v35 }
  0x60   :  { %154 = vmatpush2.xpose.msra.mxu0 %v103_v36 }
  0x61   :  { %155 = vmatprep.subr.mxu0 %v102_v37 }
  0x64   :  { %156 = vmatpush2.xpose.msra.mxu0 %v101_v38 }
  0x65   :  { %157 = vmatprep.subr.mxu0 %v100_v39 }
  0x68   :  { %158 = vmatpush2.xpose.msra.mxu0 %v99_v40 }
  0x69   :  { %159 = vmatprep.subr.mxu0 %v98_v41 }
  0x6c   :  { %160 = vmatpush2.xpose.msra.mxu0 %v97_v42 }
  0x6d   :  { %161 = vmatprep.subr.mxu0 %v96_v43 }
  0x70   :  { %162 = vmatpush2.xpose.msra.mxu0 %v95_v44 }
  0x71   :  { %163 = vmatprep.subr.mxu0 %v94_v45 }
  0x74   :  { %164 = vmatpush2.xpose.msra.mxu0 %v93_v46 }
  0x75   :  { %165 = vmatprep.subr.mxu0 %v92_v47 }
  0x78   :  { %166 = vmatpush2.xpose.msra.mxu0 %v91_v48 }
  0x79   :  { %167 = vmatprep.subr.mxu0 %v90_v49 }
  0x7c   :  { %168 = vmatpush2.xpose.msra.mxu0 %v89_v50 }
  0x7d   :  { %169 = vmatprep.subr.mxu0 %v88_v51 }
  0x80   :  { %170 = vmatpush2.xpose.msra.mxu0 %v87_v52 }
  0x81   :  { %171 = vmatprep.subr.mxu0 %v86_v53 }
  0x84   :  { %172 = vmatpush2.xpose.msra.mxu0 %v85_v54 }
  0x85   :  { %173 = vmatprep.subr.mxu0 %v84_v55 }
  0x88   :  { %174 = vmatpush2.xpose.msra.mxu0 %v83_v56 }
  0x89   :  { %175 = vmatprep.subr.mxu0 %v82_v57 }
  0x8c   :  { %176 = vmatpush2.xpose.msra.mxu0 %v81_v58 }
  0x8d   :  { %177 = vmatprep.subr.mxu0 %v80_v59 }
  0x90   :  { %178 = vmatpush2.xpose.msra.mxu0 %v79_v60 }
  0x91   :  { %179 = vmatprep.subr.mxu0 %v78_v61 }
  0x94   :  { %180 = vmatpush2.xpose.msra.mxu0 %v77_v62 }
  0x95   :  { %181 = vmatprep.subr.mxu0 %v76_v63 }
  0x98   :  { %182 = vmatpush2.xpose.msra.mxu0 %v75_v0 }
  0x9b   :  { %184 = vmatmul.mubr.f32.vlgmr.msra.gmra.mxu0 %v41_v1 }
 0x15b   :  { %v185_v9 = vpop.f32.mrf.mxu0 }
 0x15c   :  { %v186_v10 = vadd.f32 %v185_v9, %v112_v7 }
 0x15d   :  { %v187_v11 = vpop.f32.mrf.mxu0 }
 0x15e   :  { %v190_v12 = vmax.f32 %v186_v10, 0.0  ;;  %v188_v13 = vadd.f32 %v187_v11, %v116_v8 }
 0x160   :  { %v192_v14 = vsub.f32 0.0, %v190_v12  ;;  %v191_v15 = vmax.f32 %v188_v13, 0.0 }
 0x162   :  { %v194_v16 = vmul.f32 1.442695, %v192_v14  ;;  %v193_v17 = vsub.f32 0.0, %v191_v15 }
 0x164   :  { %221 = vpow2.f32 %v194_v16  ;;  %v196_v18 = vmul.f32 1.442695, %v193_v17 }
 0x166   :  { %223 = vpow2.f32 %v196_v18 }
 0x171   :  { %v222_v19 = vpop.eup %221 }
 0x172   :  { %198 = vst [vmem:[#allocation7] sm:$0xff] %v222_v19 }
 0x173   :  { %v224_v20 = vpop.eup %223 }
 0x174   :  { %199 = vst [vmem:[#allocation7 + $0x8] sm:$0xff] %v224_v20 }
 0x175   :  { %276 = shalt.err (!%p273_p0)
}
 0x176   :  { %209 = dma.vmem_to_hbm [thread:$0]  %s207_s25, 256, %s331_s3, [#allocation4]  }
 0x177   :  { %289 = dma.done.wait [#allocation4], 256  }
 0x178   :  { %290 = vsyncadd [#allocation4], 4294967040 }
 0x179   :  { %213 = vsyncpa [#allocation3], 1 }
 0x17a   :  { %214 = vsyncpa [#allocation6], 1 }
 0x17b   :  { %215 = vsyncpa [#allocation4], 1 }

</bundles_post_ra>
